<compile_context>
chip_gen: v6e
topology: v6e:2x2x1
jax: 0.10.0
libtpu: 0.0.40
codegen_flags: <defaults>
</compile_context>

<pallas_src>
import functools

import jax
import jax.numpy as jnp
from jax import lax
from jax.experimental import pallas as pl
from jax.experimental.pallas import tpu as pltpu

EPS = 1e-6  # matches inter_distances(eps=1e-6)


def _make_kernel(tb, tr, np_lanes, nstrips, sqrd, thr, strip_unroll):
    """Build the per-grid-step kernel; all sizes / flags are static."""

    def kernel(slab_ref, cols_ref, out_ref):
        # slab_ref: (tb, 8, Np)  rows 0-2 pred xyz, 3-5 true xyz, 6 real-mask
        # cols_ref: (tb, Nr, 8)  per-atom [pred xyz, true xyz, real-mask, 0]
        # out_ref : (1, TR, Np)  lane-dense per-block partial sums

        def mol_body(i, block_acc):
            slab = slab_ref[i]                          # (8, Np), one load/mol
            prx, pry, prz = slab[0:1, :], slab[1:2, :], slab[2:3, :]
            trx, tryy, trz = slab[3:4, :], slab[4:5, :], slab[5:6, :]
            mrow = slab[6:7, :]                         # (1, Np) 1.0 = real

            def strip_body(s, acc):
                r0 = pl.multiple_of(s * tr, tr)
                c = cols_ref[i, pl.ds(r0, tr), :]       # (TR, 8)

                # Pairwise squared distances for this strip of rows: pure-VPU
                # broadcast outer differences (no MXU - K=3 is <3% util).
                dpx = c[:, 0:1] - prx                   # (TR, Np)
                dpy = c[:, 1:2] - pry
                dpz = c[:, 2:3] - prz
                d2p = dpx * dpx + dpy * dpy + dpz * dpz
                dtx = c[:, 3:4] - trx
                dty = c[:, 4:5] - tryy
                dtz = c[:, 5:6] - trz
                d2t = dtx * dtx + dty * dty + dtz * dtz

                if sqrd:
                    pd, td = d2p, d2t
                else:
                    # Direct sqrt form (fused identity removed): numerically
                    # robust when pred ~= true; EUP slot has slack here.
                    pd = jnp.sqrt(d2p + EPS)
                    td = jnp.sqrt(d2t + EPS)

                diff = pd - td
                err = diff * diff
                if thr is not None:
                    # threshold on the true distance (2-D mask, one select)
                    err = jnp.where(td <= thr, err, 0.0)

                # Rank-1 masking, part 1: column (row-atom) mask only.
                return acc + err * c[:, 6:7]

            acc0 = jnp.zeros((tr, np_lanes), jnp.float32)
            acc_mol = lax.fori_loop(0, nstrips, strip_body, acc0,
                                    unroll=strip_unroll)
            # Rank-1 masking, part 2: row (column-atom) mask, once/molecule.
            return block_acc + acc_mol * mrow

        block0 = jnp.zeros((tr, np_lanes), jnp.float32)
        block_acc = lax.fori_loop(0, tb, mol_body, block0)   # rolled
        out_ref[...] = block_acc[None]      # lane-dense, unmasked store

    return kernel


def _vmem_capacity_bytes():
    try:
        return int(pltpu.get_tpu_info().vmem_capacity_bytes)
    except Exception:
        return 64 << 20        # conservative fallback (v7x physical VMEM)


@functools.partial(jax.jit,
                   static_argnames=("distance_threshold", "sqrd", "tb"))
def inter_distances_loss(pred_coords, true_coords, padding_mask,
                         distance_threshold=None, sqrd=False, tb=8):
    """Scalar mean inter-distance MSE loss (compute_stats=False path).

    pred_coords, true_coords: (B, N, 3); padding_mask: (B, N), True/1 = padded.
    """
    B, N, _ = pred_coords.shape

    # ---- static tiling decisions -------------------------------------------
    np_lanes = max(128, ((N + 127) // 128) * 128)   # lane-padded column axis
    if np_lanes <= 128:
        tr = 32
    elif np_lanes <= 256:
        tr = 16
    else:
        tr = 8                                      # keep strip temps <= ~8 vregs
    nr = ((N + tr - 1) // tr) * tr                  # row-padded row axis
    nstrips = nr // tr
    strip_unroll = 2 if (nstrips % 2 == 0 and tr * np_lanes <= 4096) else 1

    tb = max(1, min(int(tb), B))
    if B >= 2:
        tb = min(tb, (B + 1) // 2)   # >= 2 grid steps so v7x can use both TCs

    cap = int(_vmem_capacity_bytes() * 0.8)         # headroom for compiler scratch

    def est_bytes(tb_):
        slab_buf = tb_ * 8 * np_lanes * 4
        cols_buf = tb_ * nr * 128 * 4               # minor dim 8 lane-pads to 128
        out_buf = tr * np_lanes * 4
        return 2 * (slab_buf + cols_buf + out_buf) + (2 << 20)

    while tb > 1 and est_bytes(tb) > cap:
        tb = (tb + 1) // 2

    num_blocks = (B + tb - 1) // tb
    bp = num_blocks * tb
    vmem_limit = int(min(max(est_bytes(tb), 32 << 20), cap))

    # ---- input packing (layout plumbing only, O(B*N)) ----------------------
    predf = pred_coords.astype(jnp.float32)
    truef = true_coords.astype(jnp.float32)
    real = 1.0 - padding_mask.astype(jnp.float32)   # 1.0 = real atom

    slab = jnp.zeros((bp, 8, np_lanes), jnp.float32)
    slab = slab.at[:B, 0:3, :N].set(jnp.transpose(predf, (0, 2, 1)))
    slab = slab.at[:B, 3:6, :N].set(jnp.transpose(truef, (0, 2, 1)))
    slab = slab.at[:B, 6, :N].set(real)

    cols = jnp.zeros((bp, nr, 8), jnp.float32)
    cols = cols.at[:B, :N, 0:3].set(predf)
    cols = cols.at[:B, :N, 3:6].set(truef)
    cols = cols.at[:B, :N, 6].set(real)

    kernel = _make_kernel(tb, tr, np_lanes, nstrips, sqrd,
                          distance_threshold, strip_unroll)
    partials = pl.pallas_call(
        kernel,
        out_shape=jax.ShapeDtypeStruct((num_blocks, tr, np_lanes), jnp.float32),
        grid_spec=pltpu.PrefetchScalarGridSpec(
            num_scalar_prefetch=0,
            grid=(num_blocks,),
            in_specs=[
                pl.BlockSpec((tb, 8, np_lanes), lambda g: (g, 0, 0)),
                pl.BlockSpec((tb, nr, 8), lambda g: (g, 0, 0)),
            ],
            out_specs=pl.BlockSpec((1, tr, np_lanes), lambda g: (g, 0, 0)),
        ),
        compiler_params=pltpu.CompilerParams(
            dimension_semantics=("parallel",),
            vmem_limit_bytes=vmem_limit),
    )(slab, cols)

    # dists_loss.mean() over the full (B, N, N) tensor (masked zeros included,
    # exactly as the torch module does).
    return jnp.sum(partials) / jnp.float32(B * N * N)


def _reference(pred, true, pad, distance_threshold=None, sqrd=False):
    """Pure-JAX reference mirroring the PyTorch module (compute_stats=False)."""
    def dists(c):
        diff = c[:, :, None, :] - c[:, None, :, :]
        d2 = diff[..., 0] ** 2 + diff[..., 1] ** 2 + diff[..., 2] ** 2
        return d2 if sqrd else jnp.sqrt(d2 + EPS)

    pd = dists(pred)
    td = dists(true)
    real = 1.0 - pad.astype(jnp.float32)
    m2 = real[:, :, None] * real[:, None, :]
    if distance_threshold is not None:
        m2 = m2 * (td <= distance_threshold).astype(jnp.float32)
    return jnp.mean((pd - td) ** 2 * m2)


if __name__ == "__main__":
    key = jax.random.PRNGKey(0)
    k1, k2 = jax.random.split(key)

    B, N = 6, 32
    pred_coords = jax.random.normal(k1, (B, N, 3), dtype=jnp.float32) * 2.0
    true_coords = jax.random.normal(k2, (B, N, 3), dtype=jnp.float32) * 2.0
    # last 5 atoms of each molecule are padding
    padding_mask = jnp.concatenate(
        [jnp.zeros((B, N - 5), dtype=jnp.bool_),
         jnp.ones((B, 5), dtype=jnp.bool_)], axis=1)

    configs = [
        (None, False),   # default: sqrt distances, no threshold
        (None, True),    # squared distances
        (4.0, False),    # threshold on sqrt distances
        (20.0, True),    # threshold on squared distances
    ]
    for thr, sqrd in configs:
        loss = inter_distances_loss(pred_coords, true_coords, padding_mask,
                                    distance_threshold=thr, sqrd=sqrd, tb=8)
        loss = jax.block_until_ready(loss)
        ref = _reference(pred_coords, true_coords, padding_mask,
                         distance_threshold=thr, sqrd=sqrd)
        assert jnp.allclose(loss, ref, atol=1e-6, rtol=1e-4), (thr, sqrd, loss, ref)

    print("KERNEL_OK")
</pallas_src>

<mosaic_0001>
module attributes {stable_mosaic.version = 11 : i64} {
  func.func @kernel(%arg0: i32, %arg1: memref<3x8x128xf32, #tpu.memory_space<vmem>>, %arg2: memref<3x32x8xf32, #tpu.memory_space<vmem>>, %arg3: memref<1x32x128xf32, #tpu.memory_space<vmem>>) attributes {dimension_semantics = [#tpu.dimension_semantics<parallel>], iteration_bounds = array<i64: 2>, scalar_prefetch = 0 : i64, scratch_operands = 0 : i64, tpu.core_type = #tpu.core_type<tc>, window_params = [{transform_indices = @transform_0, window_bounds = array<i64: 3, 8, 128>}, {transform_indices = @transform_1, window_bounds = array<i64: 3, 32, 8>}, {transform_indices = @transform_2, window_bounds = array<i64: 1, 32, 128>}]} {
    %cst = arith.constant 0.000000e+00 : f32
    %0 = vector.broadcast %cst : f32 to vector<32x128xf32>
    %c0_i32 = arith.constant 0 : i32
    %c3_i32 = arith.constant 3 : i32
    %1 = arith.addi %c0_i32, %c3_i32 : i32
    %c1_i32 = arith.constant 1 : i32
    %2 = scf.for %arg4 = %c0_i32 to %1 step %c1_i32 iter_args(%arg5 = %0) -> (vector<32x128xf32>)  : i32 {
      %5 = arith.index_cast %arg4 : i32 to index
      %c0_3 = arith.constant 0 : index
      %c0_4 = arith.constant 0 : index
      %6 = vector.load %arg1[%5, %c0_3, %c0_4] : memref<3x8x128xf32, #tpu.memory_space<vmem>>, vector<1x8x128xf32>
      %7 = vector.shape_cast %6 : vector<1x8x128xf32> to vector<8x128xf32>
      %8 = vector.extract_strided_slice %7 {offsets = [0, 0], sizes = [1, 128], strides = [1, 1]} : vector<8x128xf32> to vector<1x128xf32>
      %9 = vector.extract_strided_slice %7 {offsets = [1, 0], sizes = [1, 128], strides = [1, 1]} : vector<8x128xf32> to vector<1x128xf32>
      %10 = vector.extract_strided_slice %7 {offsets = [2, 0], sizes = [1, 128], strides = [1, 1]} : vector<8x128xf32> to vector<1x128xf32>
      %11 = vector.extract_strided_slice %7 {offsets = [3, 0], sizes = [1, 128], strides = [1, 1]} : vector<8x128xf32> to vector<1x128xf32>
      %12 = vector.extract_strided_slice %7 {offsets = [4, 0], sizes = [1, 128], strides = [1, 1]} : vector<8x128xf32> to vector<1x128xf32>
      %13 = vector.extract_strided_slice %7 {offsets = [5, 0], sizes = [1, 128], strides = [1, 1]} : vector<8x128xf32> to vector<1x128xf32>
      %14 = vector.extract_strided_slice %7 {offsets = [6, 0], sizes = [1, 128], strides = [1, 1]} : vector<8x128xf32> to vector<1x128xf32>
      %cst_5 = arith.constant 0.000000e+00 : f32
      %15 = vector.broadcast %cst_5 : f32 to vector<32x128xf32>
      %c0_i32_6 = arith.constant 0 : i32
      %c32_i32 = arith.constant 32 : i32
      %16 = arith.muli %c0_i32_6, %c32_i32 : i32
      %17 = tpu.assume_multiple %16, 32 : i32
      %18 = arith.index_cast %arg4 : i32 to index
      %19 = arith.index_cast %17 : i32 to index
      %c0_7 = arith.constant 0 : index
      %20 = vector.load %arg2[%18, %19, %c0_7] : memref<3x32x8xf32, #tpu.memory_space<vmem>>, vector<1x32x8xf32>
      %21 = vector.shape_cast %20 : vector<1x32x8xf32> to vector<32x8xf32>
      %22 = vector.extract_strided_slice %21 {offsets = [0, 0], sizes = [32, 1], strides = [1, 1]} : vector<32x8xf32> to vector<32x1xf32>
      %23 = vector.broadcast %22 : vector<32x1xf32> to vector<32x128xf32>
      %24 = vector.broadcast %8 : vector<1x128xf32> to vector<32x128xf32>
      %25 = arith.subf %23, %24 : vector<32x128xf32>
      %26 = vector.extract_strided_slice %21 {offsets = [0, 1], sizes = [32, 1], strides = [1, 1]} : vector<32x8xf32> to vector<32x1xf32>
      %27 = vector.broadcast %26 : vector<32x1xf32> to vector<32x128xf32>
      %28 = vector.broadcast %9 : vector<1x128xf32> to vector<32x128xf32>
      %29 = arith.subf %27, %28 : vector<32x128xf32>
      %30 = vector.extract_strided_slice %21 {offsets = [0, 2], sizes = [32, 1], strides = [1, 1]} : vector<32x8xf32> to vector<32x1xf32>
      %31 = vector.broadcast %30 : vector<32x1xf32> to vector<32x128xf32>
      %32 = vector.broadcast %10 : vector<1x128xf32> to vector<32x128xf32>
      %33 = arith.subf %31, %32 : vector<32x128xf32>
      %34 = arith.mulf %25, %25 : vector<32x128xf32>
      %35 = arith.mulf %29, %29 : vector<32x128xf32>
      %36 = arith.addf %34, %35 : vector<32x128xf32>
      %37 = arith.mulf %33, %33 : vector<32x128xf32>
      %38 = arith.addf %36, %37 : vector<32x128xf32>
      %39 = vector.extract_strided_slice %21 {offsets = [0, 3], sizes = [32, 1], strides = [1, 1]} : vector<32x8xf32> to vector<32x1xf32>
      %40 = vector.broadcast %39 : vector<32x1xf32> to vector<32x128xf32>
      %41 = vector.broadcast %11 : vector<1x128xf32> to vector<32x128xf32>
      %42 = arith.subf %40, %41 : vector<32x128xf32>
      %43 = vector.extract_strided_slice %21 {offsets = [0, 4], sizes = [32, 1], strides = [1, 1]} : vector<32x8xf32> to vector<32x1xf32>
      %44 = vector.broadcast %43 : vector<32x1xf32> to vector<32x128xf32>
      %45 = vector.broadcast %12 : vector<1x128xf32> to vector<32x128xf32>
      %46 = arith.subf %44, %45 : vector<32x128xf32>
      %47 = vector.extract_strided_slice %21 {offsets = [0, 5], sizes = [32, 1], strides = [1, 1]} : vector<32x8xf32> to vector<32x1xf32>
      %48 = vector.broadcast %47 : vector<32x1xf32> to vector<32x128xf32>
      %49 = vector.broadcast %13 : vector<1x128xf32> to vector<32x128xf32>
      %50 = arith.subf %48, %49 : vector<32x128xf32>
      %51 = arith.mulf %42, %42 : vector<32x128xf32>
      %52 = arith.mulf %46, %46 : vector<32x128xf32>
      %53 = arith.addf %51, %52 : vector<32x128xf32>
      %54 = arith.mulf %50, %50 : vector<32x128xf32>
      %55 = arith.addf %53, %54 : vector<32x128xf32>
      %cst_8 = arith.constant 9.99999997E-7 : f32
      %56 = vector.broadcast %cst_8 : f32 to vector<32x128xf32>
      %57 = arith.addf %38, %56 : vector<32x128xf32>
      %58 = math.sqrt %57 : vector<32x128xf32>
      %cst_9 = arith.constant 9.99999997E-7 : f32
      %59 = vector.broadcast %cst_9 : f32 to vector<32x128xf32>
      %60 = arith.addf %55, %59 : vector<32x128xf32>
      %61 = math.sqrt %60 : vector<32x128xf32>
      %62 = arith.subf %58, %61 : vector<32x128xf32>
      %63 = arith.mulf %62, %62 : vector<32x128xf32>
      %64 = vector.extract_strided_slice %21 {offsets = [0, 6], sizes = [32, 1], strides = [1, 1]} : vector<32x8xf32> to vector<32x1xf32>
      %65 = vector.broadcast %64 : vector<32x1xf32> to vector<32x128xf32>
      %66 = arith.mulf %63, %65 : vector<32x128xf32>
      %67 = arith.addf %15, %66 : vector<32x128xf32>
      %c1_i32_10 = arith.constant 1 : i32
      %68 = vector.broadcast %14 : vector<1x128xf32> to vector<32x128xf32>
      %69 = arith.mulf %67, %68 : vector<32x128xf32>
      %70 = arith.addf %arg5, %69 : vector<32x128xf32>
      scf.yield %70 : vector<32x128xf32>
    }
    %c3_i32_0 = arith.constant 3 : i32
    %3 = vector.shape_cast %2 : vector<32x128xf32> to vector<1x32x128xf32>
    %c0 = arith.constant 0 : index
    %c0_1 = arith.constant 0 : index
    %c0_2 = arith.constant 0 : index
    %4 = vector.load %arg3[%c0, %c0_1, %c0_2] : memref<1x32x128xf32, #tpu.memory_space<vmem>>, vector<1x32x128xf32>
    tpu.vector_store %arg3[%c0, %c0_1, %c0_2], %3 {strides = array<i32>} : memref<1x32x128xf32, #tpu.memory_space<vmem>>, vector<1x32x128xf32>,
    return
  }
  func.func @transform_0(%arg0: i32) -> (i32, i32, i32) {
    %c0_i32 = arith.constant 0 : i32
    %c0_i32_0 = arith.constant 0 : i32
    %c0_i32_1 = arith.constant 0 : i32
    return %arg0, %c0_i32, %c0_i32_0 : i32, i32, i32
  }
  func.func @transform_1(%arg0: i32) -> (i32, i32, i32) {
    %c0_i32 = arith.constant 0 : i32
    %c0_i32_0 = arith.constant 0 : i32
    %c0_i32_1 = arith.constant 0 : i32
    return %arg0, %c0_i32, %c0_i32_0 : i32, i32, i32
  }
  func.func @transform_2(%arg0: i32) -> (i32, i32, i32) {
    %c0_i32 = arith.constant 0 : i32
    %c0_i32_0 = arith.constant 0 : i32
    %c0_i32_1 = arith.constant 0 : i32
    return %arg0, %c0_i32, %c0_i32_0 : i32, i32, i32
  }
}

</mosaic_0001>

<bundles_post_ra>
// kernel: inter_distances_loss.1
= control target key start
LH: loop header
LB: loop body
LE: loop exit
PB: predicated region body
PF: predicated region fallthrough
CT: control target
= control target key end

     0   :  { %s750_s9 = smov 0   ;;  %s917_s0 = inlined_call_operand.vmem [shape: f32[6,8,128], index: 0, kind: input, shape index: {}]   ;;  %s918_s1 = inlined_call_operand.vmem [shape: f32[6,32,8], index: 1, kind: input, shape index: {}]   ;;  %s919_s2 = inlined_call_operand.vmem [shape: f32[2,32,128], index: 2, kind: output, shape index: {}]  }
   0x1 LB: > { %s579_s10 = sadd.s32 4294967295, %s706_s9   ;;  %p583_p0 = scmp.ge.s32.totalorder %s706_s9, 1  ;;  %s706_s9 = sphi %s750_s9, %s12_s9  }
   0x2   : > { %p125_p1 = scmp.lt.s32.totalorder %s706_s9, 3 }
   0x4   : > { %p126_p2 = pnand %p583_p0, %p125_p1 }
   0x5   : > { %s153_s11 = smul.u32 (!%p126_p2), 3, %s579_s10  ;;  %p166_p3 = scmp.lt.s32.totalorder (!%p126_p2), %s579_s10, 1 }
   0x6   : > { %129 = sbr.rel (%p126_p2) target bundleno = 236 (0xec), region = 28  ;;  %s781_s24 = smov (!%p126_p2), 0  }
   0x7   : > { %p154_p4 = scmp.lt.s32.totalorder (!%p126_p2), %s153_s11, 5 }
   0xb   : > { %s925_s10 = smov (!%p166_p3, %s579_s10), 1  ;;  %s927_s11 = smov (!%p154_p4, %s153_s11), 5  ;;  %v773_v0 = vmov 0.0   ;;  %v775_v1 = vmov 0.0   ;;  %v777_v2 = vmov 0.0   ;;  %v779_v3 = vmov 0.0  }
   0xc   : > { %s594_s12 = sshll.u32 %s925_s10, 5  ;;  %s584_s13 = sshll.u32 %s927_s11, 3 }
   0xd   : > { %s593_s14 = sshll.u32 %s927_s11, 5  ;;  %s761_s17 = scalar_lea.vmem %s917_s0, %s584_s13 }
   0xe   : > { %s766_s20 = scalar_lea.vmem %s918_s1, %s593_s14  ;;  %s771_s23 = scalar_lea.vmem %s919_s2, %s594_s12 }
   0xf LB: >> { %v728_v4 = vmov 0   ;;  %s590_s25 = sshll.u32 %s726_s24, 5  ;;  %v729_v9 = vmov 1   ;;  %v730_v10 = vmov 3   ;;  %v731_v11 = vmov 4   ;;  %s589_s27 = sshll.u32 %s726_s24, 3  ;;  %s726_s24 = sphi %s781_s24, %s176_s24   ;;  %v722_v3 = vphi %v779_v3, %v923_v3   ;;  %v718_v2 = vphi %v777_v2, %v922_v2   ;;  %v714_v1 = vphi %v775_v1, %v921_v1   ;;  %v710_v0 = vphi %v773_v0, %v920_v0  }
  0x10   : >> { %651 = vset.pattern.permute.xlu1 %v728_v4  ;;  %650 = vset.pattern.permute.xlu0 %v728_v4  ;;  %s186_s26 = scalar_lea.vmem %s766_s20, %s590_s25  ;;  %v732_v12 = vmov 2   ;;  %v733_v13 = vmov 5   ;;  %v734_v14 = vmov 6   ;;  %v211_v23 = vlaneseq  ;;  %s182_s28 = scalar_lea.vmem %s761_s17, %s589_s27 }
  0x11   : >> { %v189_v5 = vld [vmem:[%s186_s26 + $0x10] sm:$0xff]  ;;  %v187_v6 = vld [vmem:[%s186_s26] sm:$0xff]  ;;  %v190_v7 = vld [vmem:[%s186_s26 + $0x18] sm:$0xff]  ;;  %s176_s24 = sadd.s32 1, %s726_s24  }
  0x12   : >> { %203 = vperm.xlu1 %651, %v189_v5   ;;  %193 = vperm.xlu0 %650, %v187_v6   ;;  %v188_v8 = vld [vmem:[%s186_s26 + $0x8] sm:$0xff]  ;;  %v805_v26 = vshrl.u32 %v211_v23, 7  ;;  %v812_v31 = vld [vmem:[%s182_s28] sm:$0xff]  ;;  %p173_p5 = scmp.ge.s32.totalorder %s176_s24, 3  }
  0x14   : >> { %v329_v28 = vsub.s32 4, %v805_v26  ;;  %v305_v30 = vsub.s32 3, %v805_v26  ;;  %v213_v35 = vsub.s32 0, %v805_v26  ;;  %v237_v36 = vsub.s32 1, %v805_v26 }
  0x15   : >> { %v353_v38 = vsub.s32 5, %v805_v26  ;;  %v261_v41 = vsub.s32 2, %v805_v26 }
  0x16   : >> { %208 = vperm.xlu1 %651, %v190_v7   ;;  %198 = vperm.xlu0 %650, %v188_v8   ;;  %v815_v33 = vrot.slane %v812_v31, %v329_v28  ;;  %v820_v37 = vrot.slane %v812_v31, %v305_v30  ;;  %v214_v43 = vrot.slane %v812_v31, %v213_v35 }
  0x17   : >> { %v238_v44 = vrot.slane %v812_v31, %v237_v36  ;;  %v829_v46 = vrot.slane %v812_v31, %v353_v38  ;;  %v262_v53 = vrot.slane %v812_v31, %v261_v41 }
  0x1a   : >> { %653 = vset.pattern.permute.xlu1 %v729_v9  ;;  %652 = vset.pattern.permute.xlu0 %v729_v9 }
  0x1b   : >> { %224 = vperm.xlu1 %653, %v188_v8   ;;  %220 = vperm.xlu0 %652, %v187_v6  }
  0x1f   : >> { %228 = vperm.xlu1 %653, %v189_v5   ;;  %232 = vperm.xlu0 %652, %v190_v7  }
  0x23   : >> { %654 = vset.pattern.permute.xlu1 %v730_v10  ;;  %655 = vset.pattern.permute.xlu0 %v730_v10 }
  0x24   : >> { %288 = vperm.xlu1 %654, %v187_v6   ;;  %292 = vperm.xlu0 %655, %v188_v8  }
  0x28   : >> { %296 = vperm.xlu1 %654, %v189_v5   ;;  %656 = vset.pattern.permute.xlu0 %v731_v11 }
  0x29   : >> { %312 = vperm.xlu0 %656, %v187_v6  }
  0x2c   : >> { %300 = vperm.xlu1 %654, %v190_v7  }
  0x2d   : >> { %324 = vperm.xlu0 %656, %v190_v7  }
  0x30   : >> { %657 = vset.pattern.permute.xlu1 %v731_v11 }
  0x31   : >> { %316 = vperm.xlu1 %657, %v188_v8   ;;  %659 = vset.pattern.permute.xlu0 %v732_v12 }
  0x32   : >> { %248 = vperm.xlu0 %659, %v188_v8  }
  0x35   : >> { %320 = vperm.xlu1 %657, %v189_v5  }
  0x36   : >> { %660 = vset.pattern.permute.xlu0 %v733_v13 }
  0x37   : >> { %336 = vperm.xlu0 %660, %v187_v6  }
  0x39   : >> { %658 = vset.pattern.permute.xlu1 %v732_v12 }
  0x3a   : >> { %244 = vperm.xlu1 %658, %v187_v6  }
  0x3b   : >> { %348 = vperm.xlu0 %660, %v190_v7  }
  0x3e   : >> { %252 = vperm.xlu1 %658, %v189_v5  }
  0x3f   : >> { %663 = vset.pattern.permute.xlu0 %v734_v14 }
  0x40   : >> { %456 = vperm.xlu0 %663, %v188_v8  }
  0x42   : >> { %256 = vperm.xlu1 %658, %v190_v7  }
  0x46   : >> { %661 = vset.pattern.permute.xlu1 %v733_v13 }
  0x47   : >> { %340 = vperm.xlu1 %661, %v188_v8  }
  0x4b   : >> { %344 = vperm.xlu1 %661, %v189_v5  }
  0x4f   : >> { %662 = vset.pattern.permute.xlu1 %v734_v14 }
  0x50   : >> { %452 = vperm.xlu1 %662, %v187_v6  }
  0x54   : >> { %460 = vperm.xlu1 %662, %v189_v5  }
  0x58   : >> { %464 = vperm.xlu1 %662, %v190_v7  }
  0x8d   : >> { %v204_v15 = vpop.permute.xlu1 %203  ;;  %v194_v16 = vpop.permute.xlu0 %193 }
  0x8e   : >> { %v215_v47 = vsub.f32 %v194_v16, %v214_v43  ;;  %v217_v14 = vsub.f32 %v204_v15, %v214_v43 }
  0x90   : >> { %v267_v59 = vmul.f32 %v215_v47, %v215_v47  ;;  %v269_v38 = vmul.f32 %v217_v14, %v217_v14 }
  0x91   : >> { %v800_v17 = vpop.permute.xlu1 %208  ;;  %v199_v18 = vpop.permute.xlu0 %198 }
  0x92   : >> { %v216_v54 = vsub.f32 %v199_v18, %v214_v43  ;;  %v218_v30 = vsub.f32 %v800_v17, %v214_v43 }
  0x94   : >> { %v268_v7 = vmul.f32 %v216_v54, %v216_v54  ;;  %v270_v43 = vmul.f32 %v218_v30, %v218_v30 }
  0x96   : >> { %v225_v19 = vpop.permute.xlu1 %224  ;;  %v221_v20 = vpop.permute.xlu0 %220 }
  0x97   : >> { %v239_v48 = vsub.f32 %v221_v20, %v238_v44  ;;  %v240_v57 = vsub.f32 %v225_v19, %v238_v44 }
  0x99   : >> { %v271_v60 = vmul.f32 %v239_v48, %v239_v48  ;;  %v272_v10 = vmul.f32 %v240_v57, %v240_v57 }
  0x9a   : >> { %v229_v21 = vpop.permute.xlu1 %228  ;;  %v233_v22 = vpop.permute.xlu0 %232 }
  0x9b   : >> { %v241_v11 = vsub.f32 %v229_v21, %v238_v44  ;;  %v275_v16 = vadd.f32 %v271_v60, %v267_v59  ;;  %v242_v18 = vsub.f32 %v233_v22, %v238_v44  ;;  %v276_v35 = vadd.f32 %v272_v10, %v268_v7 }
  0x9d   : >> { %v273_v36 = vmul.f32 %v241_v11, %v241_v11  ;;  %v274_v15 = vmul.f32 %v242_v18, %v242_v18 }
  0x9f   : >> { %v289_v24 = vpop.permute.xlu1 %288  ;;  %v802_v25 = vpop.permute.xlu0 %292  ;;  %v277_v48 = vadd.f32 %v273_v36, %v269_v38 }
  0xa0   : >> { %v307_v45 = vsub.f32 %v289_v24, %v820_v37  ;;  %v308_v22 = vsub.f32 %v802_v25, %v820_v37 }
  0xa2   : >> { %v359_v55 = vmul.f32 %v307_v45, %v307_v45  ;;  %v360_v54 = vmul.f32 %v308_v22, %v308_v22 }
  0xa3   : >> { %v807_v27 = vpop.permute.xlu1 %296 }
  0xa4   : >> { %v313_v29 = vpop.permute.xlu0 %312 }
  0xa5   : >> { %v331_v39 = vsub.f32 %v313_v29, %v815_v33 }
  0xa7   : >> { %v301_v32 = vpop.permute.xlu1 %300  ;;  %v363_v49 = vmul.f32 %v331_v39, %v331_v39 }
  0xa8   : >> { %v325_v34 = vpop.permute.xlu0 %324  ;;  %v310_v51 = vsub.f32 %v301_v32, %v820_v37 }
  0xa9   : >> { %v334_v52 = vsub.f32 %v325_v34, %v815_v33  ;;  %v367_v61 = vadd.f32 %v363_v49, %v359_v55  ;;  %v278_v49 = vadd.f32 %v274_v15, %v270_v43 }
  0xaa   : >> { %v362_v62 = vmul.f32 %v310_v51, %v310_v51 }
  0xab   : >> { %v366_v63 = vmul.f32 %v334_v52, %v334_v52 }
  0xac   : >> { %v317_v40 = vpop.permute.xlu1 %316 }
  0xad   : >> { %v249_v42 = vpop.permute.xlu0 %248  ;;  %v370_v20 = vadd.f32 %v366_v63, %v362_v62  ;;  %v332_v41 = vsub.f32 %v317_v40, %v815_v33 }
  0xae   : >> { %v264_v4 = vsub.f32 %v249_v42, %v262_v53 }
  0xaf   : >> { %v364_v25 = vmul.f32 %v332_v41, %v332_v41 }
  0xb0   : >> { %v321_v50 = vpop.permute.xlu1 %320  ;;  %v280_v23 = vmul.f32 %v264_v4, %v264_v4 }
  0xb1   : >> { %v333_v51 = vsub.f32 %v321_v50, %v815_v33 }
  0xb2   : >> { %v337_v56 = vpop.permute.xlu0 %336  ;;  %v284_v42 = vadd.f32 %v280_v23, %v276_v35 }
  0xb3   : >> { %v355_v58 = vsub.f32 %v337_v56, %v829_v46  ;;  %v309_v56 = vsub.f32 %v807_v27, %v820_v37 }
  0xb4   : >> { %v847_v55 = vadd.f32 1e-06, %v284_v42 }
  0xb5   : >> { %v371_v5 = vmul.f32 %v355_v58, %v355_v58  ;;  %v245_v6 = vpop.permute.xlu1 %244  ;;  %v361_v62 = vmul.f32 %v309_v56, %v309_v56 }
  0xb6   : >> { %v263_v8 = vsub.f32 %v245_v6, %v262_v53  ;;  %v349_v9 = vpop.permute.xlu0 %348  ;;  %vm392_vm8 = vcmp.eq.f32.partialorder %v847_v55, inf  ;;  %vm394_vm10 = vcmp.eq.f32.partialorder %v847_v55, 0.0 }
  0xb7   : >> { %v375_v12 = vadd.f32 %v371_v5, %v367_v61  ;;  %v358_v13 = vsub.f32 %v349_v9, %v829_v46  ;;  %v368_v61 = vadd.f32 %v364_v25, %v360_v54 }
  0xb8   : >> { %v279_v19 = vmul.f32 %v263_v8, %v263_v8 }
  0xb9   : >> { %v836_v24 = vadd.f32 1e-06, %v375_v12  ;;  %v374_v28 = vmul.f32 %v358_v13, %v358_v13  ;;  %v253_v29 = vpop.permute.xlu1 %252 }
  0xba   : >> { %v283_v32 = vadd.f32 %v279_v19, %v275_v16  ;;  %v265_v34 = vsub.f32 %v253_v29, %v262_v53  ;;  %v477_v19 = vsub.s32 6, %v805_v26 }
  0xbb   : >> { %664 = vrsqrt.f32 %v836_v24  ;;  %v378_v21 = vadd.f32 %v374_v28, %v370_v20  ;;  %vm417_vm0 = vcmp.eq.f32.partialorder %v836_v24, inf  ;;  %v420_v18 = vand.u32 2147483648, %v836_v24 }
  0xbc   : >> { %v379_v39 = vadd.f32 1e-06, %v283_v32  ;;  %v281_v45 = vmul.f32 %v265_v34, %v265_v34  ;;  %vm419_vm3 = vcmp.eq.f32.partialorder %v836_v24, 0.0  ;;  %v478_v35 = vrot.slane %v812_v31, %v477_v19 }
  0xbd   : >> { %v843_v44 = vadd.f32 1e-06, %v378_v21  ;;  %v257_v17 = vpop.permute.xlu1 %256 }
  0xbe   : >> { %666 = vrsqrt.f32 %v379_v39  ;;  %v266_v47 = vsub.f32 %v257_v17, %v262_v53  ;;  %v285_v40 = vadd.f32 %v281_v45, %v277_v48  ;;  %v365_v53 = vmul.f32 %v333_v51, %v333_v51 }
  0xbf   : >> { %668 = vrsqrt.f32 %v843_v44  ;;  %vm385_vm1 = vcmp.eq.f32.partialorder %v379_v39, inf  ;;  %v388_v16 = vand.u32 2147483648, %v379_v39  ;;  %vm387_vm2 = vcmp.eq.f32.partialorder %v379_v39, 0.0 }
  0xc0   : >> { %v282_v52 = vmul.f32 %v266_v47, %v266_v47  ;;  %670 = vrsqrt.f32 %v847_v55  ;;  %v853_v33 = vadd.f32 1e-06, %v285_v40  ;;  %v369_v27 = vadd.f32 %v365_v53, %v361_v62 }
  0xc1   : >> { %vm438_vm4 = vcmp.eq.f32.partialorder %v843_v44, inf  ;;  %v441_v22 = vand.u32 2147483648, %v843_v44  ;;  %vm440_vm7 = vcmp.eq.f32.partialorder %v843_v44, 0.0  ;;  %v395_v40 = vand.u32 2147483648, %v847_v55 }
  0xc2   : >> { %v286_v57 = vadd.f32 %v282_v52, %v278_v49  ;;  %v341_v58 = vpop.permute.xlu1 %340  ;;  %vm399_vm12 = vcmp.eq.f32.partialorder %v853_v33, inf  ;;  %vm401_vm14 = vcmp.eq.f32.partialorder %v853_v33, 0.0 }
  0xc3   : >> { %v356_v59 = vsub.f32 %v341_v58, %v829_v46 }
  0xc4   : >> { %v382_v60 = vadd.f32 1e-06, %v286_v57 }
  0xc5   : >> { %v372_v50 = vmul.f32 %v356_v59, %v356_v59 }
  0xc6   : >> { %672 = vrsqrt.f32 %v382_v60  ;;  %v345_v63 = vpop.permute.xlu1 %344  ;;  %vm406_vm5 = vcmp.eq.f32.partialorder %v382_v60, inf  ;;  %vm408_vm6 = vcmp.eq.f32.partialorder %v382_v60, 0.0 }
  0xc7   : >> { %v376_v4 = vadd.f32 %v372_v50, %v368_v61  ;;  %v357_v5 = vsub.f32 %v345_v63, %v829_v46  ;;  %674 = vrsqrt.f32 %v853_v33  ;;  %v402_v50 = vand.u32 2147483648, %v853_v33  ;;  %v457_v63 = vpop.permute.xlu0 %456 }
  0xc8   : >> { %v665_v6 = vpop.eup %664 }
  0xc9   : >> { %v857_v37 = vadd.f32 1e-06, %v376_v4  ;;  %v373_v7 = vmul.f32 %v357_v5, %v357_v5  ;;  %v416_v8 = vmul.f32 %v665_v6, %v836_v24 }
  0xcb   : >> { %v667_v9 = vpop.eup %666  ;;  %676 = vrsqrt.f32 %v857_v37  ;;  %v377_v10 = vadd.f32 %v373_v7, %v369_v27  ;;  %v418_v12 = vsel %vm417_vm0, %v836_v24, %v416_v8  ;;  %v453_v14 = vpop.permute.xlu1 %452  ;;  %v409_v24 = vand.u32 2147483648, %v382_v60 }
  0xcc   : >> { %v384_v11 = vmul.f32 %v667_v9, %v379_v39  ;;  %v669_v13 = vpop.eup %668  ;;  %v421_v28 = vsel %vm419_vm3, %v420_v18, %v418_v12  ;;  %vm424_vm9 = vcmp.eq.f32.partialorder %v857_v37, inf  ;;  %vm426_vm11 = vcmp.eq.f32.partialorder %v857_v37, 0.0 }
  0xcd   : >> { %v863_v46 = vadd.f32 1e-06, %v377_v10  ;;  %v437_v30 = vmul.f32 %v669_v13, %v843_v44  ;;  %v671_v32 = vpop.eup %670 }
  0xce   : >> { %v386_v20 = vsel %vm385_vm1, %v379_v39, %v384_v11  ;;  %v391_v39 = vmul.f32 %v671_v32, %v847_v55 }
  0xcf   : >> { %678 = vrsqrt.f32 %v863_v46  ;;  %v389_v23 = vsel %vm387_vm2, %v388_v16, %v386_v20  ;;  %v461_v21 = vpop.permute.xlu1 %460  ;;  %v439_v15 = vsel %vm438_vm4, %v843_v44, %v437_v30  ;;  %v427_v44 = vand.u32 2147483648, %v857_v37 }
  0xd0   : >> { %v443_v29 = vsub.f32 %v389_v23, %v421_v28  ;;  %v442_v17 = vsel %vm440_vm7, %v441_v22, %v439_v15  ;;  %v393_v52 = vsel %vm392_vm8, %v847_v55, %v391_v39  ;;  %vm431_vm13 = vcmp.eq.f32.partialorder %v863_v46, inf }
  0xd1   : >> { %v396_v58 = vsel %vm394_vm10, %v395_v40, %v393_v52  ;;  %v434_v55 = vand.u32 2147483648, %v863_v46  ;;  %vm433_vm15 = vcmp.eq.f32.partialorder %v863_v46, 0.0 }
  0xd2   : >> { %v447_v34 = vmul.f32 %v443_v29, %v443_v29 }
  0xd3   : >> { %v673_v36 = vpop.eup %672  ;;  %v465_v51 = vpop.permute.xlu1 %464 }
  0xd4   : >> { %v467_v26 = vmul.f32 %v453_v14, %v447_v34  ;;  %v405_v38 = vmul.f32 %v673_v36, %v382_v60  ;;  %v675_v41 = vpop.eup %674 }
  0xd5   : >> { %v398_v49 = vmul.f32 %v675_v41, %v853_v33 }
  0xd6   : >> { %v479_v42 = vmul.f32 %v478_v35, %v467_v26  ;;  %v407_v45 = vsel %vm406_vm5, %v382_v60, %v405_v38 }
  0xd7   : >> { %v410_v31 = vsel %vm408_vm6, %v409_v24, %v407_v45  ;;  %v400_v53 = vsel %vm399_vm12, %v853_v33, %v398_v49 }
  0xd8   : >> { %v677_v43 = vpop.eup %676  ;;  %v483_v47 = vadd.f32 %v722_v3, %v479_v42   ;;  %v446_v48 = vsub.f32 %v410_v31, %v442_v17  ;;  %v403_v6 = vsel %vm401_vm14, %v402_v50, %v400_v53 }
  0xd9   : >> { %v423_v54 = vmul.f32 %v677_v43, %v857_v37 }
  0xda   : >> { %v450_v25 = vmul.f32 %v446_v48, %v446_v48  ;;  %487 = vst [vmem:[%s771_s23] sm:$0xff] (%p173_p5), %v483_v47 }
  0xdb   : >> { %v425_v3 = vsel %vm424_vm9, %v857_v37, %v423_v54 }
  0xdc   : >> { %v679_v56 = vpop.eup %678  ;;  %v470_v57 = vmul.f32 %v465_v51, %v450_v25  ;;  %v428_v59 = vsel %vm426_vm11, %v427_v44, %v425_v3  ;;  %v923_v3 = vmov %v483_v47 }
  0xdd   : >> { %v430_v60 = vmul.f32 %v679_v56, %v863_v46  ;;  %v444_v61 = vsub.f32 %v396_v58, %v428_v59 }
  0xde   : >> { %v482_v62 = vmul.f32 %v478_v35, %v470_v57 }
  0xdf   : >> { %v432_v4 = vsel %vm431_vm13, %v863_v46, %v430_v60  ;;  %v448_v5 = vmul.f32 %v444_v61, %v444_v61 }
  0xe0   : >> { %v435_v27 = vsel %vm433_vm15, %v434_v55, %v432_v4  ;;  %v486_v37 = vadd.f32 %v710_v0, %v482_v62  }
  0xe1   : >> { %v445_v7 = vsub.f32 %v403_v6, %v435_v27  ;;  %v468_v8 = vmul.f32 %v457_v63, %v448_v5 }
  0xe2   : >> { %v920_v0 = vmov %v486_v37  ;;  %490 = vst [vmem:[%s771_s23 + $0x18] sm:$0xff] (%p173_p5), %v486_v37 }
  0xe3   : >> { %v449_v9 = vmul.f32 %v445_v7, %v445_v7  ;;  %v480_v10 = vmul.f32 %v478_v35, %v468_v8 }
  0xe5   : >> { %v469_v11 = vmul.f32 %v461_v21, %v449_v9  ;;  %v484_v12 = vadd.f32 %v718_v2, %v480_v10  }
  0xe7   : >> { %v481_v13 = vmul.f32 %v478_v35, %v469_v11  ;;  %v922_v2 = vmov %v484_v12  ;;  %175 = sbr.rel (!%p173_p5) target bundleno = 15 (0xf), region = 70  ;;  %488 = vst [vmem:[%s771_s23 + $0x8] sm:$0xff] (%p173_p5), %v484_v12 }
  0xe9   : >> { %v485_v14 = vadd.f32 %v714_v1, %v481_v13  }
  0xeb   : >> { %v921_v1 = vmov %v485_v14  ;;  %489 = vst [vmem:[%s771_s23 + $0x10] sm:$0xff] (%p173_p5), %v485_v14 }
  0xec PF: > { %s12_s9 = sadd.s32 1, %s706_s9  }
  0xed   : > { %p9_p6 = scmp.ge.s32.totalorder %s12_s9, 4  }
  0xef   :  { %11 = sbr.rel (!%p9_p6) target bundleno = 1 (0x1), region = 81 }

</bundles_post_ra>
